<compile_context>
chip_gen: v7x
topology: tpu7x:2x2x1
jax: 0.10.0
libtpu: 0.0.40
codegen_flags: <defaults>
</compile_context>

<pallas_src>
import jax
import jax.numpy as jnp
from jax.experimental import pallas as pl
from jax.experimental.pallas import tpu as pltpu


def _round_up(v, m):
    return (v + m - 1) // m * m


def _link_gcn_kernel(x_ref, w_ref, s_ref, b_ref, o_ref):
    # h = X_tile @ W  (MXU, f32 accumulation)
    h = jnp.dot(x_ref[...], w_ref[...], preferred_element_type=jnp.float32)
    # message + aggregate collapse: per-node diagonal scale; update: + bias.
    o_ref[...] = (h * s_ref[...] + b_ref[...]).astype(o_ref.dtype)


def _vmem_bytes(tm, c_in_p, c_out_p, in_bytes, out_bytes):
    """Conservative per-step VMEM estimate for the pipelined tiles."""
    return (2 * tm * c_in_p * in_bytes            # X tile (double-buffered)
            + 1 * c_in_p * c_out_p * in_bytes     # W (single-buffered, resident)
            + 2 * tm * 128 * 4                    # s tile, lane-padded to 128
            + 8 * c_out_p * 4                     # bias, sublane-padded to 8
            + 2 * tm * c_out_p * out_bytes)       # output tile (double-buffered)


def link_gcn_conv(x, edge_neighbors, weight, bias=None, edge_weight=None,
                  improved=False, row_tile=1024, use_bf16=True):
    """x: [N, C_in] float, edge_neighbors: [2, E] int32,
    weight: [C_in, C_out], bias: [C_out] or None."""
    n, c_in = x.shape
    c_out = weight.shape[1]
    e = edge_neighbors.shape[1]
    out_dtype = x.dtype
    compute_dtype = jnp.bfloat16 if use_bf16 else x.dtype

    if edge_weight is None:
        edge_weight = jnp.ones((e,), dtype=x.dtype)
    ew = edge_weight.reshape(-1).astype(jnp.float32)

    row, col = edge_neighbors[0], edge_neighbors[1]
    loop_w = jnp.float32(2.0 if improved else 1.0)

    # ---- cheap per-edge scalar glue (stays in XLA) --------------------------
    # Self loops contribute exactly +loop_w to deg[i] and +loop_w*deg_inv[i]^2
    # to s[i]; fold them in densely instead of appending N scatter elements.
    deg = jax.ops.segment_sum(ew, row, num_segments=n) + loop_w
    deg_inv = deg ** -0.5
    deg_inv = jnp.where(jnp.isinf(deg_inv), 0.0, deg_inv)
    norm = deg_inv[row] * ew * deg_inv[col]                       # [E]
    # gather (h[row]) and scatter-add (onto row) use the SAME index -> collapse
    s = jax.ops.segment_sum(norm, row, num_segments=n) + loop_w * deg_inv * deg_inv

    if bias is None:
        bias = jnp.zeros((c_out,), out_dtype)

    # ---- channel alignment ---------------------------------------------------
    # 128 keeps stores lane-dense on every chip; once the layer is clearly
    # compute-bound, 256 fills the v6e/v7x 2x256x256 MXU per pass.
    lane_align = 256 if (c_in >= 1024 and c_out >= 1024) else 128
    c_in_p = _round_up(c_in, lane_align)
    c_out_p = _round_up(c_out, lane_align)

    # Pad columns only when actually needed (avoid extra full HBM passes).
    if c_in_p != c_in:
        x_k = jnp.zeros((n, c_in_p), compute_dtype).at[:, :c_in].set(
            x.astype(compute_dtype))
    else:
        x_k = x.astype(compute_dtype)
    if (c_in_p, c_out_p) != (c_in, c_out):
        w_k = jnp.zeros((c_in_p, c_out_p), compute_dtype).at[:c_in, :c_out].set(
            weight.astype(compute_dtype))
    else:
        w_k = weight.astype(compute_dtype)
    b_k = jnp.zeros((1, c_out_p), jnp.float32).at[0, :c_out].set(
        bias.astype(jnp.float32))
    s_k = s.reshape(n, 1)                                          # f32 [N,1]

    # ---- row tiling -----------------------------------------------------------
    tm = _round_up(min(row_tile, n), 8)          # multiple of 8 (sublane)
    # Megacore occupancy: give the single 'parallel' axis >= 2 tiles when N allows.
    if n > 8 and pl.cdiv(n, tm) < 2:
        tm = _round_up(pl.cdiv(n, 2), 8)
    # Keep the pipelined tiles within a conservative VMEM budget (v7x: 64 MiB).
    in_bytes = jnp.dtype(compute_dtype).itemsize
    out_bytes = jnp.dtype(out_dtype).itemsize
    vmem_budget = 40 * 1024 * 1024
    while tm > 8 and _vmem_bytes(tm, c_in_p, c_out_p, in_bytes, out_bytes) > vmem_budget:
        tm = max(8, _round_up(tm // 2, 8))
    grid = (pl.cdiv(n, tm),)                     # ragged last tile masked by Pallas

    cost = pl.CostEstimate(
        flops=2 * n * c_in_p * c_out_p,
        transcendentals=0,
        bytes_accessed=int(x_k.size * in_bytes + w_k.size * in_bytes
                           + s_k.size * 4 + b_k.size * 4
                           + n * c_out_p * out_bytes))

    out = pl.pallas_call(
        _link_gcn_kernel,
        out_shape=jax.ShapeDtypeStruct((n, c_out_p), out_dtype),
        grid_spec=pl.GridSpec(
            grid=grid,
            in_specs=[
                pl.BlockSpec((tm, c_in_p), lambda i: (i, 0)),          # X row tile
                pl.BlockSpec((c_in_p, c_out_p), lambda i: (0, 0),      # W resident,
                             pipeline_mode=pl.Buffered(1)),            #  single-buffered
                pl.BlockSpec((tm, 1), lambda i: (i, 0)),               # scale tile
                pl.BlockSpec((1, c_out_p), lambda i: (0, 0),           # bias resident
                             pipeline_mode=pl.Buffered(1)),
            ],
            out_specs=pl.BlockSpec((tm, c_out_p), lambda i: (i, 0)),
        ),
        compiler_params=pltpu.CompilerParams(
            dimension_semantics=("parallel",),       # v7x: rows split across 2 TCs
            vmem_limit_bytes=64 * 1024 * 1024),
        cost_estimate=cost,
    )(x_k, w_k, s_k, b_k)

    if c_out_p != c_out:
        out = out[:, :c_out]
    return out


def _reference(x, edge_neighbors, weight, bias, improved=False):
    """Pure-JAX reference following the PyTorch code literally
    (explicit self-loop concat + per-edge gather + scatter-add)."""
    n = x.shape[0]
    e = edge_neighbors.shape[1]
    ew = jnp.ones((e,), dtype=x.dtype)
    loop_idx = jnp.arange(n, dtype=edge_neighbors.dtype)
    en = jnp.concatenate([edge_neighbors, jnp.stack([loop_idx, loop_idx])], axis=1)
    ew = jnp.concatenate([ew, jnp.full((n,), 2.0 if improved else 1.0, x.dtype)])
    row, col = en[0], en[1]
    deg = jax.ops.segment_sum(ew, row, num_segments=n)
    deg_inv = deg ** -0.5
    deg_inv = jnp.where(jnp.isinf(deg_inv), 0.0, deg_inv)
    norm = deg_inv[row] * ew * deg_inv[col]
    h = x @ weight
    msgs = norm[:, None] * h[row]                          # message(x_l, norm)
    aggr = jax.ops.segment_sum(msgs, row, num_segments=n)  # scatter_('add', ..., row)
    return aggr + bias                                     # update


if __name__ == "__main__":
    key = jax.random.PRNGKey(0)
    kx, ks, kd, kw = jax.random.split(key, 4)

    # small shapes: N=8 "link" nodes, C_in=32, C_out=16, E=12 neighbor relations
    n, c_in, c_out, e = 8, 32, 16, 12
    x = jax.random.normal(kx, (n, c_in), jnp.float32)
    src = jax.random.randint(ks, (e,), 0, n, dtype=jnp.int32)
    dst = jax.random.randint(kd, (e,), 0, n, dtype=jnp.int32)
    edge_neighbors = jnp.stack([src, dst])

    # deterministic parameter init (glorot uniform weight, zero bias)
    limit = (6.0 / (c_in + c_out)) ** 0.5
    weight = jax.random.uniform(kw, (c_in, c_out), jnp.float32, -limit, limit)
    bias = jnp.zeros((c_out,), jnp.float32)

    ref = _reference(x, edge_neighbors, weight, bias)

    # exact f32 operand path (tight tolerance)
    out_f32 = jax.block_until_ready(
        link_gcn_conv(x, edge_neighbors, weight, bias, use_bf16=False))
    assert out_f32.shape == (n, c_out)
    assert jnp.allclose(out_f32, ref, atol=1e-4, rtol=1e-4), "f32 mismatch vs reference"

    # default bf16-operand path (f32 accumulation; looser tolerance by design)
    out_bf16 = jax.block_until_ready(
        link_gcn_conv(x, edge_neighbors, weight, bias, use_bf16=True))
    assert out_bf16.shape == (n, c_out)
    assert jnp.allclose(out_bf16, ref, atol=3e-2, rtol=3e-2), "bf16 mismatch vs reference"

    print("KERNEL_OK")
</pallas_src>

<mosaic_0001>
module attributes {stable_mosaic.version = 11 : i64} {
  func.func @_link_gcn_kernel(%arg0: i32, %arg1: memref<8x128xf32, #tpu.memory_space<vmem>>, %arg2: memref<128x128xf32, #tpu.memory_space<vmem>>, %arg3: memref<8x1xf32, #tpu.memory_space<vmem>>, %arg4: memref<1x128xf32, #tpu.memory_space<vmem>>, %arg5: memref<8x128xf32, #tpu.memory_space<vmem>>) attributes {dimension_semantics = [#tpu.dimension_semantics<parallel>], iteration_bounds = array<i64: 1>, scalar_prefetch = 0 : i64, scratch_operands = 0 : i64, tpu.core_type = #tpu.core_type<tc>, window_params = [{transform_indices = @transform_0, window_bounds = array<i64: 8, 128>}, {pipeline_mode = #tpu.pipeline_mode<synchronous>, transform_indices = @transform_1, window_bounds = array<i64: 128, 128>}, {transform_indices = @transform_2, window_bounds = array<i64: 8, 1>}, {pipeline_mode = #tpu.pipeline_mode<synchronous>, transform_indices = @transform_3, window_bounds = array<i64: 1, 128>}, {transform_indices = @transform_4, window_bounds = array<i64: 8, 128>}]} {
    %c0 = arith.constant 0 : index
    %c0_0 = arith.constant 0 : index
    %0 = vector.load %arg1[%c0, %c0_0] : memref<8x128xf32, #tpu.memory_space<vmem>>, vector<8x128xf32>
    %c0_1 = arith.constant 0 : index
    %c0_2 = arith.constant 0 : index
    %1 = vector.load %arg2[%c0_1, %c0_2] : memref<128x128xf32, #tpu.memory_space<vmem>>, vector<128x128xf32>
    %cst = arith.constant dense<0.000000e+00> : vector<8x128xf32>
    %2 = tpu.matmul %0, %1, %cst {dimension_numbers = #tpu.dot_dimension_numbers<[1], [0], [0], [1], [0, 0, 1, 1], [], []>} : vector<8x128xf32>, vector<128x128xf32>, vector<8x128xf32> -> vector<8x128xf32>
    %c0_3 = arith.constant 0 : index
    %c0_4 = arith.constant 0 : index
    %3 = vector.load %arg3[%c0_3, %c0_4] : memref<8x1xf32, #tpu.memory_space<vmem>>, vector<8x1xf32>
    %4 = vector.broadcast %3 : vector<8x1xf32> to vector<8x128xf32>
    %5 = arith.mulf %2, %4 : vector<8x128xf32>
    %c0_5 = arith.constant 0 : index
    %c0_6 = arith.constant 0 : index
    %6 = vector.load %arg4[%c0_5, %c0_6] : memref<1x128xf32, #tpu.memory_space<vmem>>, vector<1x128xf32>
    %7 = vector.broadcast %6 : vector<1x128xf32> to vector<8x128xf32>
    %8 = arith.addf %5, %7 : vector<8x128xf32>
    %c0_7 = arith.constant 0 : index
    %c0_8 = arith.constant 0 : index
    %9 = vector.load %arg5[%c0_7, %c0_8] : memref<8x128xf32, #tpu.memory_space<vmem>>, vector<8x128xf32>
    tpu.vector_store %arg5[%c0_7, %c0_8], %8 {strides = array<i32>} : memref<8x128xf32, #tpu.memory_space<vmem>>, vector<8x128xf32>,
    return
  }
  func.func @transform_0(%arg0: i32) -> (i32, i32) {
    %c0_i32 = arith.constant 0 : i32
    %c0_i32_0 = arith.constant 0 : i32
    return %arg0, %c0_i32 : i32, i32
  }
  func.func @transform_1(%arg0: i32) -> (i32, i32) {
    %c0_i32 = arith.constant 0 : i32
    %c0_i32_0 = arith.constant 0 : i32
    %c0_i32_1 = arith.constant 0 : i32
    return %c0_i32, %c0_i32_0 : i32, i32
  }
  func.func @transform_2(%arg0: i32) -> (i32, i32) {
    %c0_i32 = arith.constant 0 : i32
    %c0_i32_0 = arith.constant 0 : i32
    return %arg0, %c0_i32 : i32, i32
  }
  func.func @transform_3(%arg0: i32) -> (i32, i32) {
    %c0_i32 = arith.constant 0 : i32
    %c0_i32_0 = arith.constant 0 : i32
    %c0_i32_1 = arith.constant 0 : i32
    return %c0_i32, %c0_i32_0 : i32, i32
  }
  func.func @transform_4(%arg0: i32) -> (i32, i32) {
    %c0_i32 = arith.constant 0 : i32
    %c0_i32_0 = arith.constant 0 : i32
    return %arg0, %c0_i32 : i32, i32
  }
}

</mosaic_0001>

<bundles_post_ra>
// kernel: tpu_custom_call.1
= control target key start
LH: loop header
LB: loop body
LE: loop exit
PB: predicated region body
PF: predicated region fallthrough
CT: control target
= control target key end

     0   :  { %9 = vsyncpa [#allocation3], 0  ;;  %s490_s0 = inlined_call_operand.hbm [shape: f32[8,128], index: 0, kind: input, shape index: {}]   ;;  %s491_s1 = inlined_call_operand.hbm [shape: f32[128,128], index: 1, kind: input, shape index: {}]   ;;  %s492_s2 = inlined_call_operand.hbm [shape: f32[8,1], index: 2, kind: input, shape index: {}]   ;;  %s493_s3 = inlined_call_operand.hbm [shape: f32[1,128], index: 3, kind: input, shape index: {}]   ;;  %s494_s4 = inlined_call_operand.hbm [shape: f32[8,128], index: 4, kind: output, shape index: {}]  }
   0x1   :  { %10 = vsyncpa [#allocation6], 0 }
   0x2   :  { %11 = vsyncpa [#allocation9], 0 }
   0x3   :  { %12 = vsyncpa [#allocation4], 0  ;;  %s394_s15 = smov [#allocation5]   ;;  %s276_s19 = scalar_lea.hbm %s491_s1, 2048 }
   0x4   :  { %s28_s16 = sshll.u32 %s394_s15, 4  ;;  %p277_p0 = scmp.ne.s32.totalorder %s491_s1, %s276_s19  ;;  %s29_s16 = int_to_ptr.vmem [resolvable:$true] %s28_s16 }
   0x5   :  { %p280_p1 = scmp.lt.u32.totalorder %s276_s19, %s491_s1 }
   0x7   :  { %p282_p2 = pnand %p280_p1, %p277_p0 }
   0x9   :  { %285 = shalt.err (!%p282_p2)
}
   0xa   :  { %s286_s24 = scalar_lea.vmem %s29_s16, 2048  ;;  %p291_p4 = scmp.lt.s32.totalorder %s29_s16, %s29_s16 }
   0xb   :  { %p287_p3 = scmp.ne.s32.totalorder %s29_s16, %s286_s24  ;;  %p292_p5 = scmp.lt.s32.totalorder %s286_s24, %s286_s24 }
   0xd   :  { %p293_p6 = por %p292_p5, %p291_p4 }
   0xf   :  { %p294_p7 = pnand %p293_p6, %p287_p3 }
  0x11   :  { %297 = shalt.err (!%p294_p7)
}
  0x12   :  { %s395_s25 = smov 128   ;;  %s396_s26 = smov 8  }
  0x13   :  { %34 = dma.hbm_to_vmem [thread:$0]  %s491_s1, 2048, %s29_s16, [#allocation6], %s395_s25, %s395_s25, %s396_s26  }
  0x14   :  { %s397_s29 = smov [#allocation2]   ;;  %s398_s5 = smov [#allocation7]  }
  0x15   :  { %s19_s30 = sshll.u32 %s397_s29, 4  ;;  %s41_s6 = sshll.u32 %s398_s5, 4  ;;  %s20_s30 = int_to_ptr.vmem [resolvable:$true] %s19_s30  ;;  %s42_s6 = int_to_ptr.vmem [resolvable:$true] %s41_s6 }
  0x16   :  { %s298_s9 = scalar_lea.hbm %s490_s0, 128 }
  0x17   :  { %p299_p8 = scmp.ne.s32.totalorder %s490_s0, %s298_s9  ;;  %p302_p9 = scmp.lt.u32.totalorder %s298_s9, %s490_s0 }
  0x19   :  { %p304_p10 = pnand %p302_p9, %p299_p8 }
  0x1b   :  { %307 = shalt.err (!%p304_p10)
}
  0x1c   :  { %s308_s1 = scalar_lea.vmem %s20_s30, 128  ;;  %p313_p12 = scmp.lt.s32.totalorder %s20_s30, %s20_s30 }
  0x1d   :  { %p309_p11 = scmp.ne.s32.totalorder %s20_s30, %s308_s1  ;;  %p314_p13 = scmp.lt.s32.totalorder %s308_s1, %s308_s1 }
  0x1f   :  { %p315_p0 = por %p314_p13, %p313_p12 }
  0x21   :  { %p316_p1 = pnand %p315_p0, %p309_p11 }
  0x23   :  { %319 = shalt.err (!%p316_p1)
}
  0x24   :  { %22 = dma.hbm_to_vmem [thread:$0]  %s490_s0, 128, %s20_s30, [#allocation3]  }
  0x25   :  { %s320_s18 = scalar_lea.hbm %s492_s2, 128 }
  0x26   :  { %p321_p2 = scmp.ne.s32.totalorder %s492_s2, %s320_s18  ;;  %p324_p3 = scmp.lt.u32.totalorder %s320_s18, %s492_s2 }
  0x28   :  { %p326_p4 = pnand %p324_p3, %p321_p2 }
  0x2a   :  { %329 = shalt.err (!%p326_p4)
}
  0x2b   :  { %s330_s23 = scalar_lea.vmem %s42_s6, 128  ;;  %p335_p6 = scmp.lt.s32.totalorder %s42_s6, %s42_s6 }
  0x2c   :  { %p331_p5 = scmp.ne.s32.totalorder %s42_s6, %s330_s23  ;;  %p336_p7 = scmp.lt.s32.totalorder %s330_s23, %s330_s23 }
  0x2e   :  { %p337_p8 = por %p336_p7, %p335_p6 }
  0x30   :  { %p338_p9 = pnand %p337_p8, %p331_p5 }
  0x32   :  { %341 = shalt.err (!%p338_p9)
}
  0x33   :  { %44 = dma.hbm_to_vmem [thread:$0]  %s492_s2, 128, %s42_s6, [#allocation6]  }
  0x34   :  { %s399_s25 = smov [#allocation8]   ;;  %s342_s29 = scalar_lea.hbm %s493_s3, 16 }
  0x35   :  { %s51_s26 = sshll.u32 %s399_s25, 4  ;;  %p343_p10 = scmp.ne.s32.totalorder %s493_s3, %s342_s29  ;;  %s52_s26 = int_to_ptr.vmem [resolvable:$true] %s51_s26 }
  0x36   :  { %p346_p11 = scmp.lt.u32.totalorder %s342_s29, %s493_s3 }
  0x38   :  { %p348_p12 = pnand %p346_p11, %p343_p10 }
  0x3a   :  { %351 = shalt.err (!%p348_p12)
}
  0x3b   :  { %s352_s9 = scalar_lea.vmem %s52_s26, 16  ;;  %s356_s2 = scalar_lea.vmem %s52_s26, 32 }
  0x3c   :  { %p353_p13 = scmp.ne.s32.totalorder %s52_s26, %s352_s9  ;;  %p357_p0 = scmp.lt.s32.totalorder %s52_s26, %s52_s26 }
  0x3d   :  { %p358_p1 = scmp.lt.s32.totalorder %s356_s2, %s352_s9 }
  0x3f   :  { %p359_p2 = por %p358_p1, %p357_p0 }
  0x41   :  { %p360_p3 = pnand %p359_p2, %p353_p13 }
  0x43   :  { %363 = shalt.err (!%p360_p3)
}
  0x44   :  { %54 = dma.hbm_to_vmem [thread:$0]  %s493_s3, 16, %s52_s26, [#allocation9]  }
  0x45   :  { %386 = dma.done.wait [#allocation3], 128  }
  0x46   :  { %387 = vsyncadd [#allocation3], 4294967168 }
  0x47   :  { %388 = dma.done.wait [#allocation6], 2176  }
  0x48   :  { %389 = vsyncadd [#allocation6], 4294965120 }
  0x49   :  { %390 = dma.done.wait [#allocation9], 16  }
  0x4a   :  { %391 = vsyncadd [#allocation9], 4294967280  ;;  %v400_v0 = vmov 0.0|0.0   ;;  %vm401_vm0 = vmmov 0   ;;  %v402_v1 = vmov 0.0   ;;  %v403_v2 = vmov 0  }
  0x4b   :  { %240 = vmatprep.subr.bf16.mxu0 %v400_v0  ;;  %237 = vmatprep.mubr.msk.f32.mxu0 %vm401_vm0, %v402_v1  ;;  %v68_v3 = vld [vmem:[#allocation5] sm:$0xff]  ;;  %v69_v4 = vld [vmem:[#allocation5 + $0x8] sm:$0xff]  ;;  %v70_v5 = vld [vmem:[#allocation5 + $0x10] sm:$0xff]  ;;  %s404_s3 = smov [#allocation10]  }
  0x4c   :  { %275 = vset.pattern.permute.xlu0 %v403_v2  ;;  %v241_v6 = vpack.c.bf16 %v69_v4, %v68_v3  ;;  %v71_v7 = vld [vmem:[#allocation5 + $0x18] sm:$0xff]  ;;  %v72_v9 = vld [vmem:[#allocation5 + $0x20] sm:$0xff]  ;;  %v73_v10 = vld [vmem:[#allocation5 + $0x28] sm:$0xff]  ;;  %s176_s11 = sshll.u32 %s404_s3, 4  ;;  %s177_s11 = int_to_ptr.vmem [resolvable:$true] %s176_s11 }
  0x4d   :  { %v244_v8 = vpack.c.bf16 %v71_v7, %v70_v5  ;;  %v154_v11 = vld [vmem:[#allocation7] sm:$0xff]  ;;  %v247_v12 = vpack.c.bf16 %v73_v10, %v72_v9  ;;  %v74_v13 = vld [vmem:[#allocation5 + $0x30] sm:$0xff]  ;;  %v75_v14 = vld [vmem:[#allocation5 + $0x38] sm:$0xff]  ;;  %s364_s12 = scalar_lea.vmem %s177_s11, 128  ;;  %p369_p5 = scmp.lt.s32.totalorder %s177_s11, %s177_s11 }
  0x4e   :  { %242 = vmatpush3.bf16.msra.mxu0 %v241_v6  ;;  %157 = vperm.xlu0 %275, %v154_v11   ;;  %v250_v15 = vpack.c.bf16 %v75_v14, %v74_v13  ;;  %v76_v16 = vld [vmem:[#allocation5 + $0x40] sm:$0xff]  ;;  %v77_v17 = vld [vmem:[#allocation5 + $0x48] sm:$0xff]  ;;  %v78_v19 = vld [vmem:[#allocation5 + $0x50] sm:$0xff]  ;;  %p365_p4 = scmp.ne.s32.totalorder %s177_s11, %s364_s12  ;;  %p370_p6 = scmp.lt.s32.totalorder %s364_s12, %s364_s12 }
  0x4f   :  { %243 = vmatprep.subr.bf16.mxu0 %v400_v0  ;;  %v253_v18 = vpack.c.bf16 %v77_v17, %v76_v16  ;;  %v79_v20 = vld [vmem:[#allocation5 + $0x58] sm:$0xff]  ;;  %v80_v22 = vld [vmem:[#allocation5 + $0x60] sm:$0xff]  ;;  %v81_v23 = vld [vmem:[#allocation5 + $0x68] sm:$0xff] }
  0x50   :  { %v256_v21 = vpack.c.bf16 %v79_v20, %v78_v19  ;;  %v259_v24 = vpack.c.bf16 %v81_v23, %v80_v22  ;;  %v82_v25 = vld [vmem:[#allocation5 + $0x70] sm:$0xff]  ;;  %v83_v26 = vld [vmem:[#allocation5 + $0x78] sm:$0xff]  ;;  %v187_v31 = vld [vmem:[#allocation8] ss:$0 sm:$0xff]  ;;  %p371_p7 = por %p370_p6, %p369_p5 }
  0x51   :  { %v262_v27 = vpack.c.bf16 %v83_v26, %v82_v25  ;;  %v67_v28 = vld [vmem:[#allocation2] sm:$0xff] }
  0x52   :  { %245 = vmatpush3.bf16.msra.mxu0 %v244_v8  ;;  %p372_p8 = pnand %p371_p7, %p365_p4 }
  0x53   :  { %246 = vmatprep.subr.bf16.mxu0 %v400_v0 }
  0x56   :  { %248 = vmatpush3.bf16.msra.mxu0 %v247_v12 }
  0x57   :  { %249 = vmatprep.subr.bf16.mxu0 %v400_v0 }
  0x5a   :  { %251 = vmatpush3.bf16.msra.mxu0 %v250_v15 }
  0x5b   :  { %252 = vmatprep.subr.bf16.mxu0 %v400_v0 }
  0x5e   :  { %254 = vmatpush3.bf16.msra.mxu0 %v253_v18 }
  0x5f   :  { %255 = vmatprep.subr.bf16.mxu0 %v400_v0 }
  0x62   :  { %257 = vmatpush3.bf16.msra.mxu0 %v256_v21 }
  0x63   :  { %258 = vmatprep.subr.bf16.mxu0 %v400_v0 }
  0x66   :  { %260 = vmatpush3.bf16.msra.mxu0 %v259_v24 }
  0x67   :  { %261 = vmatprep.subr.bf16.mxu0 %v400_v0 }
  0x6a   :  { %263 = vmatpush3.bf16.msra.mxu0 %v262_v27 }
  0x6d   :  { %238 = vmatmul.mubr.f32.vlgmr.msra.gmra.mrb[0].mxu0 %v67_v28 }
  0xcd   :  { %v158_v29 = vpop.permute.xlu0 %157 }
 0x140   :  { %v150_v30 = vpop.f32.mrb[0].mxu0 }
 0x141   :  { %v160_v32 = vmul.f32 %v158_v29, %v150_v30  ;;  %v239_v33 = vpop.f32.mrb[1].mxu0 }
 0x143   :  { %v168_v34 = vadd.f32 %v187_v31, %v160_v32 }
 0x145   :  { %169 = vst [vmem:[#allocation10] sm:$0xff] %v168_v34 }
 0x146   :  { %375 = shalt.err (!%p372_p8)
}
 0x147   :  { %s376_s14 = scalar_lea.hbm %s494_s4, 128 }
 0x148   :  { %p377_p9 = scmp.ne.s32.totalorder %s494_s4, %s376_s14  ;;  %p380_p10 = scmp.lt.u32.totalorder %s376_s14, %s494_s4 }
 0x14a   :  { %p382_p11 = pnand %p380_p10, %p377_p9 }
 0x14c   :  { %385 = shalt.err (!%p382_p11)
}
 0x14d   :  { %179 = dma.vmem_to_hbm [thread:$0]  %s177_s11, 128, %s494_s4, [#allocation4]  }
 0x14e   :  { %392 = dma.done.wait [#allocation4], 128  }
 0x14f   :  { %393 = vsyncadd [#allocation4], 4294967168 }
 0x150   :  { %183 = vsyncpa [#allocation3], 1 }
 0x151   :  { %184 = vsyncpa [#allocation6], 1 }
 0x152   :  { %185 = vsyncpa [#allocation9], 1 }
 0x153   :  { %186 = vsyncpa [#allocation4], 1 }

</bundles_post_ra>
